<compile_context>
chip_gen: v5e
topology: v5e:2x2
jax: 0.10.0
libtpu: 0.0.40
codegen_flags: <defaults>
</compile_context>

<pallas_src>
import functools

import jax
import jax.numpy as jnp
from jax.experimental import pallas as pl
from jax.experimental.pallas import tpu as pltpu


# ---------------------------------------------------------------------------
# Kernel 1: elementwise normalization  x -> (tanh(x)+1)/2*255  (lane-dense slab)
# ---------------------------------------------------------------------------
def _normalize_kernel(x_ref, o_ref):
    x = x_ref[...].astype(jnp.float32)
    o_ref[...] = ((jnp.tanh(x) + 1.0) * 0.5 * 255.0).astype(o_ref.dtype)


def normalize(x):
    """(tanh(x)+1)/2*255 on a lane-dense (N*C, H*W) slab with big blocks."""
    n, c, h, w = x.shape
    rows, cols = n * c, h * w
    flat = x.reshape(rows, cols)

    # Biggest row tile that keeps one (double-buffered) block comfortably in VMEM.
    budget = 8 << 20
    row_bytes = cols * x.dtype.itemsize
    if rows * row_bytes <= budget:
        rt = rows                              # single big block, one grid step
    else:
        rt = rows                              # fallback (unrealistic shapes)
        d = 8
        while d <= rows:
            if rows % d == 0 and d * row_bytes <= budget:
                rt = d                         # largest multiple-of-8 divisor
            d += 8

    out = pl.pallas_call(
        _normalize_kernel,
        out_shape=jax.ShapeDtypeStruct((rows, cols), x.dtype),
        grid=(rows // rt,),
        in_specs=[pl.BlockSpec((rt, cols), lambda i: (i, 0))],
        out_specs=pl.BlockSpec((rt, cols), lambda i: (i, 0)),
        compiler_params=pltpu.CompilerParams(dimension_semantics=("parallel",)),
    )(flat)
    return out.reshape(n, c, h, w)


# ---------------------------------------------------------------------------
# Gaussian pyramid (plain-JAX glue): separable, stride-2 depthwise convs.
# 6-tap kernel = binomial-5 convolved with [1,1]/2, so this is *exactly* the
# previous 5x5 blur (reflect pad) followed by a 2x2 box average (== bilinear
# 0.5x, align_corners=False), with the decimation folded into the convs.
# ---------------------------------------------------------------------------
_K6 = jnp.array([1.0, 5.0, 10.0, 10.0, 5.0, 1.0], dtype=jnp.float32) / 32.0


def _pyrdown(x):
    n, c, h, w = x.shape
    xp = jnp.pad(x, ((0, 0), (0, 0), (2, 2), (2, 2)), mode="reflect")
    k_h = jnp.broadcast_to(_K6.reshape(1, 1, 1, 6), (c, 1, 1, 6)).astype(x.dtype)
    k_v = jnp.broadcast_to(_K6.reshape(1, 1, 6, 1), (c, 1, 6, 1)).astype(x.dtype)
    y = jax.lax.conv_general_dilated(
        xp, k_h, window_strides=(1, 2), padding="VALID",
        dimension_numbers=("NCHW", "OIHW", "NCHW"), feature_group_count=c)
    y = jax.lax.conv_general_dilated(
        y, k_v, window_strides=(2, 1), padding="VALID",
        dimension_numbers=("NCHW", "OIHW", "NCHW"), feature_group_count=c)
    return y


def build_pyramid(x, max_level):
    pyr = [x]
    for _ in range(max_level - 1):
        pyr.append(_pyrdown(pyr[-1]))
    return pyr


# ---------------------------------------------------------------------------
# Kernel 2: fused per-level lacunarity (global avg pool), lane-dense (C, H*W)
# blocks, spatial reductions on the MXU, reciprocal on the EUP.
# ---------------------------------------------------------------------------
def _make_lacunarity_kernel(num_levels, eps):
    def kernel(*refs):
        x_refs = refs[:num_levels]
        o_ref = refs[num_levels]                        # (1, ct, L)
        for lev, xr in enumerate(x_refs):
            x = xr[0].astype(jnp.float32)               # (ct, HW_lev), lane-dense
            ct, hw = x.shape
            n_pts = float(hw)
            # Spatial sums via MXU ones-vector matmul (not XLU over sparse vregs).
            ones = jnp.ones((hw, 1), jnp.float32)
            s = jnp.dot(x, ones, preferred_element_type=jnp.float32)       # (ct, 1)
            s2 = jnp.dot(x * x, ones, preferred_element_type=jnp.float32)  # (ct, 1)
            # L_r = n^2*E[x^2] / ((n*E[x])^2 + eps) - 1
            #     = n*sum(x^2) / (sum(x)^2 + eps) - 1     (exact algebra)
            numer = n_pts * s2
            denom = s * s
            l_r = numer * pl.reciprocal(denom + eps, approx=True) - 1.0
            o_ref[0, :, lev:lev + 1] = l_r.astype(o_ref.dtype)
    return kernel


def _pick_channel_tile(c, bytes_per_channel, budget=4 << 20):
    """Largest channel tile (divisor of C; multiple of 8 unless == C) whose
    per-step staged bytes fit the budget -- keeps double buffering inside
    v7x's 64 MiB VMEM while feeding both of its TensorCores via the grid."""
    if c * bytes_per_channel <= budget:
        return c
    best = c
    d = 8
    while d <= c:
        if c % d == 0 and d * bytes_per_channel <= budget:
            best = d
        d += 8
    return best


def ms_lacunarity_forward(x, conv_w, conv_b, *, num_levels=3, eps=1e-5):
    """x: (N, C, H, W); conv_w: (C, L, 1, 1); conv_b: (C,). Returns (N, C, 1, 1)."""
    n, c, h, w = x.shape
    L = num_levels

    # 1) normalization (Pallas, lane-dense slab)
    x_norm = normalize(x)

    # 2) Gaussian pyramid (plain-JAX glue)
    pyr = build_pyramid(x_norm, L)

    # 3) per-level lacunarity (Pallas): each level presented as (N, C, H*W)
    pyr_flat = [p.reshape(n, c, p.shape[2] * p.shape[3]) for p in pyr]
    hw_list = [int(p.shape[-1]) for p in pyr_flat]

    bytes_per_channel = sum(hw * 4 for hw in hw_list)
    ct = _pick_channel_tile(c, bytes_per_channel)
    staged = 2 * ct * bytes_per_channel + 2 * ct * L * 4      # double-buffered
    vmem_limit = int(min(48 << 20, max(16 << 20, 2 * staged)))

    in_specs = [pl.BlockSpec((1, ct, hw), lambda i, j: (i, j, 0)) for hw in hw_list]
    out_specs = pl.BlockSpec((1, ct, L), lambda i, j: (i, j, 0))

    lac = pl.pallas_call(
        _make_lacunarity_kernel(L, eps),
        out_shape=jax.ShapeDtypeStruct((n, c, L), jnp.float32),
        grid=(n, c // ct),
        in_specs=in_specs,
        out_specs=out_specs,
        compiler_params=pltpu.CompilerParams(
            dimension_semantics=("parallel", "parallel"),
            vmem_limit_bytes=vmem_limit),
    )(*pyr_flat)                                              # lac[n, ch, lev]

    # 4) level-major cat + grouped 1x1 conv, exact PyTorch semantics:
    #    cat channel k = lev*C + ch; group g consumes cat channels [g*L,(g+1)*L)
    lac_cat = jnp.transpose(lac, (0, 2, 1)).reshape(n, L * c)  # [n, lev*C + ch]
    grouped = lac_cat.reshape(n, c, L)                         # row g: cat[g*L:(g+1)*L]
    w_cl = conv_w.reshape(c, L).astype(jnp.float32)            # torch weight[g, j, 0, 0]
    out = jnp.sum(grouped * w_cl[None], axis=-1) + conv_b.astype(jnp.float32)[None]
    return out.reshape(n, c, 1, 1)


# ---------------------------------------------------------------------------
if __name__ == "__main__":
    # MS_Lacunarity(dim=2, num_ftrs=4, num_levels=3, kernel=None)
    N, C, H, W = 2, 4, 16, 16
    NUM_LEVELS = 3

    key = jax.random.PRNGKey(0)
    kx, kw, kb = jax.random.split(key, 3)
    x = jax.random.normal(kx, (N, C, H, W), dtype=jnp.float32)
    # Conv2d(C*L -> C, kernel_size=1, groups=C): weight (C, L, 1, 1), bias (C,)
    conv_w = jax.random.normal(kw, (C, NUM_LEVELS, 1, 1), dtype=jnp.float32) * 0.1
    conv_b = jax.random.normal(kb, (C,), dtype=jnp.float32) * 0.1

    fwd = jax.jit(functools.partial(ms_lacunarity_forward,
                                    num_levels=NUM_LEVELS, eps=1e-5))
    out = fwd(x, conv_w, conv_b)
    out = jax.block_until_ready(out)

    assert out.shape == (N, C, 1, 1), out.shape
    assert bool(jnp.all(jnp.isfinite(out)))
    print("KERNEL_OK")
</pallas_src>

<mosaic_0001>
module attributes {stable_mosaic.version = 11 : i64} {
  func.func @_normalize_kernel(%arg0: i32, %arg1: memref<8x256xf32, #tpu.memory_space<vmem>>, %arg2: memref<8x256xf32, #tpu.memory_space<vmem>>) attributes {dimension_semantics = [#tpu.dimension_semantics<parallel>], iteration_bounds = array<i64: 1>, scalar_prefetch = 0 : i64, scratch_operands = 0 : i64, tpu.core_type = #tpu.core_type<tc>, window_params = [{transform_indices = @transform_0, window_bounds = array<i64: 8, 256>}, {transform_indices = @transform_1, window_bounds = array<i64: 8, 256>}]} {
    %c0 = arith.constant 0 : index
    %c0_0 = arith.constant 0 : index
    %0 = vector.load %arg1[%c0, %c0_0] : memref<8x256xf32, #tpu.memory_space<vmem>>, vector<8x256xf32>
    %1 = math.tanh %0 : vector<8x256xf32>
    %cst = arith.constant 1.000000e+00 : f32
    %2 = vector.broadcast %cst : f32 to vector<8x256xf32>
    %3 = arith.addf %1, %2 : vector<8x256xf32>
    %cst_1 = arith.constant 5.000000e-01 : f32
    %4 = vector.broadcast %cst_1 : f32 to vector<8x256xf32>
    %5 = arith.mulf %3, %4 : vector<8x256xf32>
    %cst_2 = arith.constant 2.550000e+02 : f32
    %6 = vector.broadcast %cst_2 : f32 to vector<8x256xf32>
    %7 = arith.mulf %5, %6 : vector<8x256xf32>
    %c0_3 = arith.constant 0 : index
    %c0_4 = arith.constant 0 : index
    %8 = vector.load %arg2[%c0_3, %c0_4] : memref<8x256xf32, #tpu.memory_space<vmem>>, vector<8x256xf32>
    tpu.vector_store %arg2[%c0_3, %c0_4], %7 {strides = array<i32>} : memref<8x256xf32, #tpu.memory_space<vmem>>, vector<8x256xf32>,
    return
  }
  func.func @transform_0(%arg0: i32) -> (i32, i32) {
    %c0_i32 = arith.constant 0 : i32
    %c0_i32_0 = arith.constant 0 : i32
    return %arg0, %c0_i32 : i32, i32
  }
  func.func @transform_1(%arg0: i32) -> (i32, i32) {
    %c0_i32 = arith.constant 0 : i32
    %c0_i32_0 = arith.constant 0 : i32
    return %arg0, %c0_i32 : i32, i32
  }
}

module attributes {stable_mosaic.version = 11 : i64} {
  func.func @kernel(%arg0: i32, %arg1: i32, %arg2: memref<1x4x256xf32, #tpu.memory_space<vmem>>, %arg3: memref<1x4x64xf32, #tpu.memory_space<vmem>>, %arg4: memref<1x4x16xf32, #tpu.memory_space<vmem>>, %arg5: memref<1x4x3xf32, #tpu.memory_space<vmem>>) attributes {dimension_semantics = [#tpu.dimension_semantics<parallel>, #tpu.dimension_semantics<parallel>], iteration_bounds = array<i64: 2, 1>, scalar_prefetch = 0 : i64, scratch_operands = 0 : i64, tpu.core_type = #tpu.core_type<tc>, window_params = [{transform_indices = @transform_0, window_bounds = array<i64: 1, 4, 256>}, {transform_indices = @transform_1, window_bounds = array<i64: 1, 4, 64>}, {transform_indices = @transform_2, window_bounds = array<i64: 1, 4, 16>}, {transform_indices = @transform_3, window_bounds = array<i64: 1, 4, 3>}]} {
    %c0 = arith.constant 0 : index
    %c0_0 = arith.constant 0 : index
    %c0_1 = arith.constant 0 : index
    %0 = vector.load %arg2[%c0, %c0_0, %c0_1] : memref<1x4x256xf32, #tpu.memory_space<vmem>>, vector<1x4x256xf32>
    %1 = vector.shape_cast %0 : vector<1x4x256xf32> to vector<4x256xf32>
    %cst = arith.constant 1.000000e+00 : f32
    %2 = vector.broadcast %cst : f32 to vector<256x1xf32>
    %cst_2 = arith.constant dense<0.000000e+00> : vector<4x1xf32>
    %3 = tpu.matmul %1, %2, %cst_2 {dimension_numbers = #tpu.dot_dimension_numbers<[1], [0], [0], [1], [0, 0, 1, 1], [], []>} : vector<4x256xf32>, vector<256x1xf32>, vector<4x1xf32> -> vector<4x1xf32>
    %4 = arith.mulf %1, %1 : vector<4x256xf32>
    %cst_3 = arith.constant dense<0.000000e+00> : vector<4x1xf32>
    %5 = tpu.matmul %4, %2, %cst_3 {dimension_numbers = #tpu.dot_dimension_numbers<[1], [0], [0], [1], [0, 0, 1, 1], [], []>} : vector<4x256xf32>, vector<256x1xf32>, vector<4x1xf32> -> vector<4x1xf32>
    %cst_4 = arith.constant 2.560000e+02 : f32
    %6 = vector.broadcast %cst_4 : f32 to vector<4x1xf32>
    %7 = arith.mulf %6, %5 : vector<4x1xf32>
    %8 = arith.mulf %3, %3 : vector<4x1xf32>
    %cst_5 = arith.constant 9.99999974E-6 : f32
    %9 = vector.broadcast %cst_5 : f32 to vector<4x1xf32>
    %10 = arith.addf %8, %9 : vector<4x1xf32>
    %11 = tpu.reciprocal %10 {approx = true} : vector<4x1xf32> -> vector<4x1xf32>
    %12 = arith.mulf %7, %11 : vector<4x1xf32>
    %cst_6 = arith.constant 1.000000e+00 : f32
    %13 = vector.broadcast %cst_6 : f32 to vector<4x1xf32>
    %14 = arith.subf %12, %13 : vector<4x1xf32>
    %c0_7 = arith.constant 0 : index
    %c0_8 = arith.constant 0 : index
    %c0_9 = arith.constant 0 : index
    %15 = vector.load %arg5[%c0_7, %c0_8, %c0_9] : memref<1x4x3xf32, #tpu.memory_space<vmem>>, vector<1x4x1xf32>
    %16 = vector.shape_cast %15 : vector<1x4x1xf32> to vector<4x1xf32>
    %17 = vector.shape_cast %14 : vector<4x1xf32> to vector<1x4x1xf32>
    tpu.vector_store %arg5[%c0_7, %c0_8, %c0_9], %17 {strides = array<i32>} : memref<1x4x3xf32, #tpu.memory_space<vmem>>, vector<1x4x1xf32>,
    %c0_10 = arith.constant 0 : index
    %c0_11 = arith.constant 0 : index
    %c0_12 = arith.constant 0 : index
    %18 = vector.load %arg3[%c0_10, %c0_11, %c0_12] : memref<1x4x64xf32, #tpu.memory_space<vmem>>, vector<1x4x64xf32>
    %19 = vector.shape_cast %18 : vector<1x4x64xf32> to vector<4x64xf32>
    %cst_13 = arith.constant 1.000000e+00 : f32
    %20 = vector.broadcast %cst_13 : f32 to vector<64x1xf32>
    %cst_14 = arith.constant dense<0.000000e+00> : vector<4x1xf32>
    %21 = tpu.matmul %19, %20, %cst_14 {dimension_numbers = #tpu.dot_dimension_numbers<[1], [0], [0], [1], [0, 0, 1, 1], [], []>} : vector<4x64xf32>, vector<64x1xf32>, vector<4x1xf32> -> vector<4x1xf32>
    %22 = arith.mulf %19, %19 : vector<4x64xf32>
    %cst_15 = arith.constant dense<0.000000e+00> : vector<4x1xf32>
    %23 = tpu.matmul %22, %20, %cst_15 {dimension_numbers = #tpu.dot_dimension_numbers<[1], [0], [0], [1], [0, 0, 1, 1], [], []>} : vector<4x64xf32>, vector<64x1xf32>, vector<4x1xf32> -> vector<4x1xf32>
    %cst_16 = arith.constant 6.400000e+01 : f32
    %24 = vector.broadcast %cst_16 : f32 to vector<4x1xf32>
    %25 = arith.mulf %24, %23 : vector<4x1xf32>
    %26 = arith.mulf %21, %21 : vector<4x1xf32>
    %cst_17 = arith.constant 9.99999974E-6 : f32
    %27 = vector.broadcast %cst_17 : f32 to vector<4x1xf32>
    %28 = arith.addf %26, %27 : vector<4x1xf32>
    %29 = tpu.reciprocal %28 {approx = true} : vector<4x1xf32> -> vector<4x1xf32>
    %30 = arith.mulf %25, %29 : vector<4x1xf32>
    %cst_18 = arith.constant 1.000000e+00 : f32
    %31 = vector.broadcast %cst_18 : f32 to vector<4x1xf32>
    %32 = arith.subf %30, %31 : vector<4x1xf32>
    %c0_19 = arith.constant 0 : index
    %c0_20 = arith.constant 0 : index
    %c1 = arith.constant 1 : index
    %33 = vector.load %arg5[%c0_19, %c0_20, %c1] : memref<1x4x3xf32, #tpu.memory_space<vmem>>, vector<1x4x1xf32>
    %34 = vector.shape_cast %33 : vector<1x4x1xf32> to vector<4x1xf32>
    %35 = vector.shape_cast %32 : vector<4x1xf32> to vector<1x4x1xf32>
    tpu.vector_store %arg5[%c0_19, %c0_20, %c1], %35 {strides = array<i32>} : memref<1x4x3xf32, #tpu.memory_space<vmem>>, vector<1x4x1xf32>,
    %c0_21 = arith.constant 0 : index
    %c0_22 = arith.constant 0 : index
    %c0_23 = arith.constant 0 : index
    %36 = vector.load %arg4[%c0_21, %c0_22, %c0_23] : memref<1x4x16xf32, #tpu.memory_space<vmem>>, vector<1x4x16xf32>
    %37 = vector.shape_cast %36 : vector<1x4x16xf32> to vector<4x16xf32>
    %cst_24 = arith.constant 1.000000e+00 : f32
    %38 = vector.broadcast %cst_24 : f32 to vector<16x1xf32>
    %cst_25 = arith.constant dense<0.000000e+00> : vector<4x1xf32>
    %39 = tpu.matmul %37, %38, %cst_25 {dimension_numbers = #tpu.dot_dimension_numbers<[1], [0], [0], [1], [0, 0, 1, 1], [], []>} : vector<4x16xf32>, vector<16x1xf32>, vector<4x1xf32> -> vector<4x1xf32>
    %40 = arith.mulf %37, %37 : vector<4x16xf32>
    %cst_26 = arith.constant dense<0.000000e+00> : vector<4x1xf32>
    %41 = tpu.matmul %40, %38, %cst_26 {dimension_numbers = #tpu.dot_dimension_numbers<[1], [0], [0], [1], [0, 0, 1, 1], [], []>} : vector<4x16xf32>, vector<16x1xf32>, vector<4x1xf32> -> vector<4x1xf32>
    %cst_27 = arith.constant 1.600000e+01 : f32
    %42 = vector.broadcast %cst_27 : f32 to vector<4x1xf32>
    %43 = arith.mulf %42, %41 : vector<4x1xf32>
    %44 = arith.mulf %39, %39 : vector<4x1xf32>
    %cst_28 = arith.constant 9.99999974E-6 : f32
    %45 = vector.broadcast %cst_28 : f32 to vector<4x1xf32>
    %46 = arith.addf %44, %45 : vector<4x1xf32>
    %47 = tpu.reciprocal %46 {approx = true} : vector<4x1xf32> -> vector<4x1xf32>
    %48 = arith.mulf %43, %47 : vector<4x1xf32>
    %cst_29 = arith.constant 1.000000e+00 : f32
    %49 = vector.broadcast %cst_29 : f32 to vector<4x1xf32>
    %50 = arith.subf %48, %49 : vector<4x1xf32>
    %c0_30 = arith.constant 0 : index
    %c0_31 = arith.constant 0 : index
    %c2 = arith.constant 2 : index
    %51 = vector.load %arg5[%c0_30, %c0_31, %c2] : memref<1x4x3xf32, #tpu.memory_space<vmem>>, vector<1x4x1xf32>
    %52 = vector.shape_cast %51 : vector<1x4x1xf32> to vector<4x1xf32>
    %53 = vector.shape_cast %50 : vector<4x1xf32> to vector<1x4x1xf32>
    tpu.vector_store %arg5[%c0_30, %c0_31, %c2], %53 {strides = array<i32>} : memref<1x4x3xf32, #tpu.memory_space<vmem>>, vector<1x4x1xf32>,
    return
  }
  func.func @transform_0(%arg0: i32, %arg1: i32) -> (i32, i32, i32) {
    %c0_i32 = arith.constant 0 : i32
    %c0_i32_0 = arith.constant 0 : i32
    return %arg0, %arg1, %c0_i32 : i32, i32, i32
  }
  func.func @transform_1(%arg0: i32, %arg1: i32) -> (i32, i32, i32) {
    %c0_i32 = arith.constant 0 : i32
    %c0_i32_0 = arith.constant 0 : i32
    return %arg0, %arg1, %c0_i32 : i32, i32, i32
  }
  func.func @transform_2(%arg0: i32, %arg1: i32) -> (i32, i32, i32) {
    %c0_i32 = arith.constant 0 : i32
    %c0_i32_0 = arith.constant 0 : i32
    return %arg0, %arg1, %c0_i32 : i32, i32, i32
  }
  func.func @transform_3(%arg0: i32, %arg1: i32) -> (i32, i32, i32) {
    %c0_i32 = arith.constant 0 : i32
    %c0_i32_0 = arith.constant 0 : i32
    return %arg0, %arg1, %c0_i32 : i32, i32, i32
  }
}

</mosaic_0001>

<bundles_post_ra>
// kernel: ms_lacunarity_forward.2
= control target key start
LH: loop header
LB: loop body
LE: loop exit
PB: predicated region body
PF: predicated region fallthrough
CT: control target
= control target key end

     0   :  { %s50_s0 = inlined_call_operand.vmem [shape: f32[8,256], index: 0, kind: input, shape index: {}]   ;;  %s51_s1 = inlined_call_operand.vmem [shape: f32[8,256], index: 1, kind: output, shape index: {}]  }
   0x1   :  { %v8_v0 = vld [vmem:[%s50_s0] sm:$0xff]  ;;  %v9_v1 = vld [vmem:[%s50_s0 + $0x8] sm:$0xff] }
   0x2   :  { %24 = vtanh.f32 %v8_v0 }
   0x3   :  { %26 = vtanh.f32 %v9_v1 }
   0x8   :  { %v25_v2 = vpop.eup %24 }
   0x9   :  { %v27_v3 = vpop.eup %26  ;;  %v12_v4 = vadd.f32 1.0, %v25_v2 }
   0xa   :  { %v13_v5 = vadd.f32 1.0, %v27_v3 }
   0xb   :  { %v14_v6 = vmul.f32 0.5, %v12_v4 }
   0xc   :  { %v15_v7 = vmul.f32 0.5, %v13_v5 }
   0xd   :  { %v16_v8 = vmul.f32 255.0, %v14_v6 }
   0xe   :  { %v17_v9 = vmul.f32 255.0, %v15_v7 }
   0xf   :  { %18 = vst [vmem:[%s51_s1] sm:$0xff] %v16_v8 }
  0x10   :  { %19 = vst [vmem:[%s51_s1 + $0x8] sm:$0xff] %v17_v9 }

// kernel: ms_lacunarity_forward.3
= control target key start
LH: loop header
LB: loop body
LE: loop exit
PB: predicated region body
PF: predicated region fallthrough
CT: control target
= control target key end

     0   :  { %s693_s12 = smov 0   ;;  %s695_s13 = smov 0   ;;  %s825_s0 = inlined_call_operand.vmem [shape: f32[2,4,256], index: 0, kind: input, shape index: {}]   ;;  %s826_s1 = inlined_call_operand.vmem [shape: f32[2,4,64], index: 1, kind: input, shape index: {}]   ;;  %s827_s2 = inlined_call_operand.vmem [shape: f32[2,4,16], index: 2, kind: input, shape index: {}]   ;;  %s828_s3 = inlined_call_operand.vmem [shape: f32[2,4,3], index: 3, kind: output, shape index: {}]  }
   0x1   :  { %s697_s14 = smov 0  }
   0x2 LB: > { %s25_s15 = sadd.s32 1, %s664_s13  ;;  %p597_p0 = scmp.ge.s32.totalorder %s668_s14, 1  ;;  %s668_s14 = sphi %s697_s14, %s13_s14   ;;  %s664_s13 = sphi %s695_s13, %s830_s13   ;;  %s660_s12 = sphi %s693_s12, %s829_s12  }
   0x3   : > { %p27_p1 = scmp.ge.s32.totalorder %s25_s15, 2  ;;  %p185_p2 = scmp.lt.s32.totalorder %s668_s14, 3 }
   0x5   : > { %s832_s15 = smov (%p27_p1, %s25_s15), 0  ;;  %p186_p3 = pnand %p597_p0, %p185_p2 }
   0x6   : > { %p229_p4 = scmp.lt.s32.totalorder (!%p186_p3), %s660_s12, 1  ;;  %s671_s30 = smov (!%p186_p3), 1  }
   0x7   : > { %189 = sbr.rel (%p186_p3) target bundleno = 325 (0x145), region = 32  ;;  %s672_s4 = smov (!%p186_p3), 2  }
   0xc   : > { %v670_v0 = vmov 1.0   ;;  %s834_s12 = smov (!%p229_p4, %s660_s12), 1  ;;  %vm423_vm0 = vcmask 130048   ;;  %vm362_vm1 = vcmask 523264   ;;  %vm359_vm2 = vcmask 3072  }
   0xd   : > { %266 = vmatpush.msra.mxu0 %v670_v0  ;;  %286 = vmatpush.msra.mxu1 %v670_v0  ;;  %s612_s16 = sshll.u32 %s834_s12, 3  ;;  %s784_s20 = sshll.u32 %s834_s12, 2  ;;  %vm420_vm3 = vcmask 11272   ;;  %vm481_vm4 = vcmask 19472  }
   0xe   : > { %313 = vmatpush.msra.mxu2 %v670_v0  ;;  %333 = vmatpush.msra.mxu3 %v670_v0  ;;  %s237_s19 = scalar_lea.vmem %s825_s0, %s612_s16  ;;  %s251_s23 = scalar_lea.vmem %s827_s2, %s784_s20 }
   0xf   : > { %267 = vmatpush.msra.mxu0 %v670_v0  ;;  %287 = vmatpush.msra.mxu1 %v670_v0  ;;  %v259_v1 = vld [vmem:[%s237_s19] sm:$0xff]  ;;  %s244_s26 = scalar_lea.vmem %s826_s1, %s784_s20  ;;  %s258_s29 = scalar_lea.vmem %s828_s3, %s784_s20 }
  0x10   : > { %314 = vmatpush.msra.mxu2 %v670_v0  ;;  %334 = vmatpush.msra.mxu3 %v670_v0  ;;  %261 = vst [vmem:[#allocation1] ss:$2 sm:$0xff] %v259_v1  ;;  %v306_v2 = vmul.f32 %v259_v1, %v259_v1  ;;  %v422_v7 = vld [vmem:[%s251_s23] sm:$0xf] }
  0x11   : > { %268 = vmatpush.msra.mxu0 %v670_v0  ;;  %288 = vmatpush.msra.mxu1 %v670_v0  ;;  %v447_v8 = vmul.f32 %v422_v7, %v422_v7  ;;  %v361_v9 = vld [vmem:[%s244_s26] sm:$0xf] }
  0x12   : > { %315 = vmatpush.msra.mxu2 %v670_v0  ;;  %335 = vmatpush.msra.mxu3 %v670_v0  ;;  %v386_v10 = vmul.f32 %v361_v9, %v361_v9 }
  0x13   : > { %269 = vmatpush.msra.mxu0 %v670_v0  ;;  %289 = vmatpush.msra.mxu1 %v670_v0 }
  0x14   : > { %316 = vmatpush.msra.mxu2 %v670_v0  ;;  %336 = vmatpush.msra.mxu3 %v670_v0 }
  0x15   : > { %270 = vmatpush.msra.mxu0 %v670_v0  ;;  %290 = vmatpush.msra.mxu1 %v670_v0 }
  0x16   : > { %317 = vmatpush.msra.mxu2 %v670_v0  ;;  %337 = vmatpush.msra.mxu3 %v670_v0 }
  0x17   : > { %271 = vmatpush.msra.mxu0 %v670_v0  ;;  %291 = vmatpush.msra.mxu1 %v670_v0  ;;  %v262_v3 = vld.sshfl [vmem:[#allocation1] sm:$0xff pattern:$0x75316420]  ;;  %v263_v4 = vld.sshfl [vmem:[#allocation1 + $0x8] sm:$0xff pattern:$0x75316420] }
  0x18   : > { %318 = vmatpush.msra.mxu2 %v670_v0  ;;  %338 = vmatpush.msra.mxu3 %v670_v0  ;;  %308 = vst [vmem:[#allocation1] ss:$2 sm:$0xff] %v306_v2 }
  0x19   : > { %272 = vmatpush.msra.mxu0 %v670_v0  ;;  %292 = vmatpush.msra.mxu1 %v670_v0 }
  0x1a   : > { %319 = vmatpush.msra.mxu2 %v670_v0  ;;  %339 = vmatpush.msra.mxu3 %v670_v0 }
  0x1b   : > { %273 = vmatpush.msra.mxu0 %v670_v0  ;;  %293 = vmatpush.msra.mxu1 %v670_v0 }
  0x1c   : > { %320 = vmatpush.msra.mxu2 %v670_v0  ;;  %340 = vmatpush.msra.mxu3 %v670_v0 }
  0x1d   : > { %274 = vmatpush.msra.mxu0 %v670_v0  ;;  %294 = vmatpush.msra.mxu1 %v670_v0 }
  0x1e   : > { %321 = vmatpush.msra.mxu2 %v670_v0  ;;  %341 = vmatpush.msra.mxu3 %v670_v0 }
  0x1f   : > { %275 = vmatpush.msra.mxu0 %v670_v0  ;;  %295 = vmatpush.msra.mxu1 %v670_v0  ;;  %v309_v5 = vld.sshfl [vmem:[#allocation1] sm:$0xff pattern:$0x75316420]  ;;  %v310_v6 = vld.sshfl [vmem:[#allocation1 + $0x8] sm:$0xff pattern:$0x75316420] }
  0x20   : > { %322 = vmatpush.msra.mxu2 %v670_v0  ;;  %342 = vmatpush.msra.mxu3 %v670_v0 }
  0x21   : > { %276 = vmatpush.msra.mxu0 %v670_v0  ;;  %296 = vmatpush.msra.mxu1 %v670_v0 }
  0x22   : > { %323 = vmatpush.msra.mxu2 %v670_v0  ;;  %343 = vmatpush.msra.mxu3 %v670_v0 }
  0x23   : > { %277 = vmatpush.msra.mxu0 %v670_v0  ;;  %297 = vmatpush.msra.mxu1 %v670_v0 }
  0x24   : > { %324 = vmatpush.msra.mxu2 %v670_v0  ;;  %344 = vmatpush.msra.mxu3 %v670_v0 }
  0x25   : > { %278 = vmatpush.msra.mxu0 %v670_v0  ;;  %298 = vmatpush.msra.mxu1 %v670_v0 }
  0x26   : > { %325 = vmatpush.msra.mxu2 %v670_v0  ;;  %345 = vmatpush.msra.mxu3 %v670_v0 }
  0x27   : > { %279 = vmatpush.msra.mxu0 %v670_v0  ;;  %299 = vmatpush.msra.mxu1 %v670_v0 }
  0x28   : > { %326 = vmatpush.msra.mxu2 %v670_v0  ;;  %346 = vmatpush.msra.mxu3 %v670_v0 }
  0x29   : > { %280 = vmatpush.msra.mxu0 %v670_v0  ;;  %300 = vmatpush.msra.mxu1 %v670_v0 }
  0x2a   : > { %327 = vmatpush.msra.mxu2 %v670_v0  ;;  %347 = vmatpush.msra.mxu3 %v670_v0 }
  0x2b   : > { %281 = vmatpush.msra.mxu0 %v670_v0  ;;  %301 = vmatpush.msra.mxu1 %v670_v0 }
  0x2c   : > { %302 = vmatmul.f32.vlgmr.msra.gmra.mxu1 %v263_v4  ;;  %282 = vmatmul.f32.vlgmr.msra.gmra.mxu0 %v262_v3 }
  0x2d   : > { %374 = vmatpush.msrb.mxu0 %v670_v0  ;;  %328 = vmatpush.msra.mxu2 %v670_v0 }
  0x2e   : > { %348 = vmatpush.msra.mxu3 %v670_v0  ;;  %329 = vmatmul.f32.vlgmr.msra.gmra.mxu2 %v309_v5 }
  0x2f   : > { %375 = vmatpush.msrb.mxu0 %v670_v0  ;;  %349 = vmatmul.f32.vlgmr.msra.gmra.mxu3 %v310_v6 }
  0x30   : > { %398 = vmatpush.msrb.mxu1 %v670_v0  ;;  %441 = vmatpush.msrb.mxu2 %v670_v0 }
  0x31   : > { %376 = vmatpush.msrb.mxu0 %v670_v0  ;;  %465 = vmatpush.msrb.mxu3 %v670_v0 }
  0x32   : > { %399 = vmatpush.msrb.mxu1 %v670_v0  ;;  %442 = vmatpush.msrb.mxu2 %v670_v0 }
  0x33   : > { %377 = vmatpush.msrb.mxu0 %v670_v0  ;;  %466 = vmatpush.msrb.mxu3 %v670_v0 }
  0x34   : > { %400 = vmatpush.msrb.mxu1 %v670_v0 }
  0x35   : > { %378 = vmatpush.msrb.mxu0 %v670_v0 }
  0x36   : > { %401 = vmatpush.msrb.mxu1 %v670_v0  ;;  %607 = vmatmul.msk.f32.vlgmr.msrb.gmra.mxu2 %vm423_vm0, %v422_v7 }
  0x37   : > { %379 = vmatpush.msrb.mxu0 %v670_v0  ;;  %608 = vmatmul.msk.f32.vlgmr.msrb.gmra.mxu3 %vm423_vm0, %v447_v8 }
  0x38   : > { %402 = vmatpush.msrb.mxu1 %v670_v0 }
  0x39   : > { %380 = vmatpush.msrb.mxu0 %v670_v0 }
  0x3a   : > { %403 = vmatpush.msrb.mxu1 %v670_v0 }
  0x3b   : > { %381 = vmatpush.msrb.mxu0 %v670_v0 }
  0x3c   : > { %604 = vmatmul.msk.f32.vlgmr.msrb.gmra.mxu0 %vm362_vm1, %v361_v9  ;;  %404 = vmatpush.msrb.mxu1 %v670_v0 }
  0x3e   : > { %405 = vmatpush.msrb.mxu1 %v670_v0 }
  0x3f   : > { %605 = vmatmul.msk.f32.vlgmr.msrb.gmra.mxu1 %vm362_vm1, %v386_v10 }
  0xa9   : > { %v303_v11 = vpop.f32.mrf.mxu1  ;;  %v283_v12 = vpop.f32.mrf.mxu0 }
  0xaa   : > { %v304_v13 = vadd.f32 %v303_v11, %v283_v12 }
  0xac   : > { %v354_v14 = vmul.f32 %v304_v13, %v304_v13 }
  0xae   : > { %v355_v15 = vadd.f32 1e-05, %v354_v14 }
  0xb0   : > { %640 = vrcp.f32 %v355_v15 }
  0xb1   : > { %v330_v16 = vpop.f32.mrf.mxu2 }
  0xb2   : > { %v350_v17 = vpop.f32.mrf.mxu3 }
  0xb3   : > { %v351_v18 = vadd.f32 %v350_v17, %v330_v16 }
  0xb5   : > { %v353_v19 = vmul.f32 256.0, %v351_v18 }
  0xb6   : > { %v641_v20 = vpop.eup %640 }
  0xb7   : > { %v357_v21 = vmul.f32 %v641_v20, %v353_v19 }
  0xb9   : > { %v383_v22 = vpop.f32.mrf.mxu0  ;;  %v603_v24 = vadd.f32 -1.0, %v357_v21  ;;  %v444_v25 = vpop.f32.mrf.mxu2 }
  0xba   : > { %v411_v23 = vmul.f32 %v383_v22, %v383_v22  ;;  %v472_v27 = vmul.f32 %v444_v25, %v444_v25  ;;  %v468_v31 = vpop.f32.mrf.mxu3 }
  0xbb   : > { %360 = vst.msk [vmem:[%s258_s29] sm:$0xf] %vm359_vm2, %v603_v24  ;;  %v471_v34 = vmul.f32 16.0, %v468_v31 }
  0xbc   : > { %v412_v26 = vadd.f32 1e-05, %v411_v23  ;;  %v473_v28 = vadd.f32 1e-05, %v472_v27  ;;  %v407_v29 = vpop.f32.mrf.mxu1 }
  0xbd   : > { %v410_v30 = vmul.f32 64.0, %v407_v29 }
  0xbe   : > { %642 = vrcp.f32 %v412_v26 }
  0xbf   : > { %644 = vrcp.f32 %v473_v28 }
  0xc4   : > { %v643_v32 = vpop.eup %642 }
  0xc5   : > { %v414_v33 = vmul.f32 %v643_v32, %v410_v30  ;;  %v645_v35 = vpop.eup %644 }
  0xc6   : > { %v475_v37 = vmul.f32 %v645_v35, %v471_v34 }
  0xc7   : > { %v606_v36 = vadd.f32 -1.0, %v414_v33 }
  0xc8   : > { %v609_v38 = vadd.f32 -1.0, %v475_v37 }
  0xc9   : > { %417 = vrot.lane.b32.xlu0 %v606_v36, %s671_s30 }
  0xd1   : > { %478 = vrot.lane.b32.xlu0 %v609_v38, %s672_s4 }
 0x13b   : > { %v418_v39 = vpop.permute.xlu0 %417 }
 0x13c   : > { %421 = vst.msk [vmem:[%s258_s29] sm:$0xf] %vm420_vm3, %v418_v39 }
 0x143   : > { %v479_v40 = vpop.permute.xlu0 %478 }
 0x144   : > { %482 = vst.msk [vmem:[%s258_s29] sm:$0xf] %vm481_vm4, %v479_v40 }
 0x145 PF: > { %s13_s14 = sadd.s32 1, %s668_s14   ;;  %s829_s12 = smov %s664_s13 }
 0x146   : > { %p10_p5 = scmp.ge.s32.totalorder %s13_s14, 4   ;;  %s830_s13 = smov %s832_s15 }
 0x148   :  { %12 = sbr.rel (!%p10_p5) target bundleno = 2 (0x2), region = 68 }

</bundles_post_ra>
